<compile_context>
chip_gen: v7x
topology: tpu7x:2x2x1
jax: 0.10.0
libtpu: 0.0.40
codegen_flags: <defaults>
</compile_context>

<pallas_src>
import jax
import jax.numpy as jnp
from jax.experimental import pallas as pl
from jax.experimental.pallas import tpu as pltpu

INPUT_SIZE = 28 * 28        # 784
HIDDEN = 256
NUM_TASKS = 5
OUT = 2
OUT_PAD = 128               # lane-dense head output width


def _round_up(n, m):
    return ((n + m - 1) // m) * m


def _choose_tb(B, tb_max):
    """Batch tile: multiple of 16 (bf16 sublane pack), >= 2 grid steps when the
    batch is big enough (v7x megacore), capped at tb_max."""
    if B <= 16:
        return _round_up(B, 8)
    return min(tb_max, _round_up(pl.cdiv(B, 2), 16))


def mlp_kernel(task_id_ref,          # scalar-prefetch ref (SMEM), used by index_maps
               x_ref, w1_ref, b1_ref, w2_ref, b2_ref, wh_ref, bh_ref,
               o_ref):
    del task_id_ref  # head selection happens via BlockSpec index_map

    tb = x_ref.shape[0]

    # shared_fc1 + ReLU: f32 x tile cast to bf16 in-kernel, bf16 weights,
    # f32 accumulation on the MXU.
    x_bf = x_ref[...].astype(jnp.bfloat16)
    h = jnp.dot(x_bf, w1_ref[...], preferred_element_type=jnp.float32)
    h = jnp.maximum(h + b1_ref[...], 0.0)

    # shared_fc2 + ReLU, applied three times (as in the reference forward).
    # Hoist the (1,256)->(TB,256) bias broadcast out of the unrolled loop.
    w2 = w2_ref[...]
    b2b = jnp.broadcast_to(b2_ref[...], (tb, HIDDEN))
    for _ in range(3):
        h = jnp.dot(h.astype(jnp.bfloat16), w2,
                    preferred_element_type=jnp.float32)
        h = jnp.maximum(h + b2b, 0.0)

    # task-specific head (no activation); out-dim lane-padded to 128 so the
    # MXU result pop and the output store are unmasked.
    o_ref[...] = (jnp.dot(h.astype(jnp.bfloat16), wh_ref[...],
                          preferred_element_type=jnp.float32)
                  + bh_ref[...])


def prepare_params(params):
    """PyTorch-style f32 params -> kernel-ready params (bf16 weights, f32
    biases, head out-dim zero-padded 2 -> 128 for lane-dense stores)."""
    w1, b1, w2, b2, wh_all, bh_all = params
    wh_p = jnp.pad(wh_all.astype(jnp.float32),
                   ((0, 0), (0, 0), (0, OUT_PAD - OUT)))
    bh_p = jnp.pad(bh_all.astype(jnp.float32),
                   ((0, 0), (0, 0), (0, OUT_PAD - OUT)))
    return (w1.astype(jnp.bfloat16),
            b1.astype(jnp.float32),
            w2.astype(jnp.bfloat16),
            b2.astype(jnp.float32),
            wh_p.astype(jnp.bfloat16),
            bh_p.astype(jnp.float32))


def task_specific_mlp(x, task_id, kernel_params, *, tb_max=1024):
    """x: any shape that flattens to (-1, 784). task_id: python int or 0-d int."""
    w1, b1, w2, b2, wh_all, bh_all = kernel_params

    x2d = x.reshape(-1, INPUT_SIZE).astype(jnp.float32)   # no pad, no bf16 copy
    B = x2d.shape[0]

    TB = _choose_tb(B, tb_max)
    n_tiles = pl.cdiv(B, TB)          # ragged last tile: garbage rows, masked writes

    task_id_arr = jnp.asarray(task_id, jnp.int32).reshape(1)

    grid_spec = pltpu.PrefetchScalarGridSpec(
        num_scalar_prefetch=1,
        grid=(n_tiles,),
        in_specs=[
            pl.BlockSpec((TB, INPUT_SIZE), lambda i, tid: (i, 0)),          # x tile (f32)
            pl.BlockSpec((INPUT_SIZE, HIDDEN), lambda i, tid: (0, 0)),      # w1 (resident)
            pl.BlockSpec((1, HIDDEN), lambda i, tid: (0, 0)),               # b1
            pl.BlockSpec((HIDDEN, HIDDEN), lambda i, tid: (0, 0)),          # w2
            pl.BlockSpec((1, HIDDEN), lambda i, tid: (0, 0)),               # b2
            # task head selected by scalar-prefetched task_id
            pl.BlockSpec((None, HIDDEN, OUT_PAD), lambda i, tid: (tid[0], 0, 0)),  # wh
            pl.BlockSpec((None, 1, OUT_PAD), lambda i, tid: (tid[0], 0, 0)),       # bh
        ],
        out_specs=pl.BlockSpec((TB, OUT_PAD), lambda i, tid: (i, 0)),
    )

    out = pl.pallas_call(
        mlp_kernel,
        out_shape=jax.ShapeDtypeStruct((B, OUT_PAD), jnp.float32),
        grid_spec=grid_spec,
        compiler_params=pltpu.CompilerParams(
            dimension_semantics=("parallel",),      # batch axis: megacore on v7x
            vmem_limit_bytes=32 * 1024 * 1024,      # explicit budget; fits v7x (64 MiB)
        ),
    )(task_id_arr, x2d, w1, b1, w2, b2, wh_all, bh_all)

    return out[:, :OUT]


def init_params(key):
    """PyTorch-equivalent f32 params: weights stored as (in, out)."""
    k1, k2, k3, k4, k5, k6 = jax.random.split(key, 6)
    scale1 = 1.0 / jnp.sqrt(INPUT_SIZE)
    scale2 = 1.0 / jnp.sqrt(HIDDEN)
    w1 = jax.random.uniform(k1, (INPUT_SIZE, HIDDEN), jnp.float32, -scale1, scale1)
    b1 = jax.random.uniform(k2, (1, HIDDEN), jnp.float32, -scale1, scale1)
    w2 = jax.random.uniform(k3, (HIDDEN, HIDDEN), jnp.float32, -scale2, scale2)
    b2 = jax.random.uniform(k4, (1, HIDDEN), jnp.float32, -scale2, scale2)
    wh_all = jax.random.uniform(k5, (NUM_TASKS, HIDDEN, OUT), jnp.float32, -scale2, scale2)
    bh_all = jax.random.uniform(k6, (NUM_TASKS, 1, OUT), jnp.float32, -scale2, scale2)
    return (w1, b1, w2, b2, wh_all, bh_all)


def reference_forward(x, task_id, params):
    """Pure-JAX f32 reference matching the PyTorch module semantics."""
    w1, b1, w2, b2, wh_all, bh_all = params
    h = x.reshape(-1, INPUT_SIZE).astype(jnp.float32)
    h = jnp.maximum(h @ w1 + b1, 0.0)
    for _ in range(3):
        h = jnp.maximum(h @ w2 + b2, 0.0)
    return h @ wh_all[task_id] + bh_all[task_id]


if __name__ == "__main__":
    key = jax.random.PRNGKey(0)
    pkey, xkey = jax.random.split(key)
    params = init_params(pkey)
    kparams = prepare_params(params)   # bf16 cast + head lane-pad, done once

    # Small batch of MNIST-like inputs (NCHW); forward flattens to (-1, 784).
    x = jax.random.normal(xkey, (8, 1, 28, 28), jnp.float32)
    task_id = 3

    out = task_specific_mlp(x, task_id, kparams)
    out = jax.block_until_ready(out)

    ref = reference_forward(x, task_id, params)
    assert out.shape == (8, OUT), out.shape
    # bf16 MXU operands with f32 accumulation -> loose tolerance vs f32 reference.
    err = jnp.max(jnp.abs(out - ref))
    assert jnp.allclose(out, ref, atol=5e-2, rtol=5e-2), f"max err {err}"
    print("KERNEL_OK")
</pallas_src>

<mosaic_0001>
module attributes {stable_mosaic.version = 11 : i64} {
  func.func @mlp_kernel(%arg0: i32, %arg1: memref<1xi32, #tpu.memory_space<smem>>, %arg2: memref<8x784xf32, #tpu.memory_space<vmem>>, %arg3: memref<784x256xbf16, #tpu.memory_space<vmem>>, %arg4: memref<1x256xf32, #tpu.memory_space<vmem>>, %arg5: memref<256x256xbf16, #tpu.memory_space<vmem>>, %arg6: memref<1x256xf32, #tpu.memory_space<vmem>>, %arg7: memref<1x256x128xbf16, #tpu.memory_space<vmem>>, %arg8: memref<1x1x128xf32, #tpu.memory_space<vmem>>, %arg9: memref<8x128xf32, #tpu.memory_space<vmem>>) attributes {dimension_semantics = [#tpu.dimension_semantics<parallel>], iteration_bounds = array<i64: 1>, scalar_prefetch = 1 : i64, scratch_operands = 0 : i64, tpu.core_type = #tpu.core_type<tc>, window_params = [{transform_indices = @transform_0, window_bounds = array<i64: 8, 784>}, {pipeline_mode = #tpu.pipeline_mode<synchronous>, transform_indices = @transform_1, window_bounds = array<i64: 784, 256>}, {pipeline_mode = #tpu.pipeline_mode<synchronous>, transform_indices = @transform_2, window_bounds = array<i64: 1, 256>}, {pipeline_mode = #tpu.pipeline_mode<synchronous>, transform_indices = @transform_3, window_bounds = array<i64: 256, 256>}, {pipeline_mode = #tpu.pipeline_mode<synchronous>, transform_indices = @transform_4, window_bounds = array<i64: 1, 256>}, {transform_indices = @transform_5, window_bounds = array<i64: 1, 256, 128>}, {transform_indices = @transform_6, window_bounds = array<i64: 1, 1, 128>}, {transform_indices = @transform_7, window_bounds = array<i64: 8, 128>}]} {
    %c0 = arith.constant 0 : index
    %c0_0 = arith.constant 0 : index
    %0 = vector.load %arg2[%c0, %c0_0] : memref<8x784xf32, #tpu.memory_space<vmem>>, vector<8x784xf32>
    %1 = arith.truncf %0 : vector<8x784xf32> to vector<8x784xbf16>
    %c0_1 = arith.constant 0 : index
    %c0_2 = arith.constant 0 : index
    %2 = vector.load %arg3[%c0_1, %c0_2] : memref<784x256xbf16, #tpu.memory_space<vmem>>, vector<784x256xbf16>
    %cst = arith.constant dense<0.000000e+00> : vector<8x256xf32>
    %3 = tpu.matmul %1, %2, %cst {dimension_numbers = #tpu.dot_dimension_numbers<[1], [0], [0], [1], [0, 0, 1, 1], [], []>} : vector<8x784xbf16>, vector<784x256xbf16>, vector<8x256xf32> -> vector<8x256xf32>
    %c0_3 = arith.constant 0 : index
    %c0_4 = arith.constant 0 : index
    %4 = vector.load %arg4[%c0_3, %c0_4] : memref<1x256xf32, #tpu.memory_space<vmem>>, vector<1x256xf32>
    %5 = vector.broadcast %4 : vector<1x256xf32> to vector<8x256xf32>
    %6 = arith.addf %3, %5 : vector<8x256xf32>
    %cst_5 = arith.constant 0.000000e+00 : f32
    %7 = vector.broadcast %cst_5 : f32 to vector<8x256xf32>
    %8 = arith.maximumf %6, %7 : vector<8x256xf32>
    %c0_6 = arith.constant 0 : index
    %c0_7 = arith.constant 0 : index
    %9 = vector.load %arg5[%c0_6, %c0_7] : memref<256x256xbf16, #tpu.memory_space<vmem>>, vector<256x256xbf16>
    %c0_8 = arith.constant 0 : index
    %c0_9 = arith.constant 0 : index
    %10 = vector.load %arg6[%c0_8, %c0_9] : memref<1x256xf32, #tpu.memory_space<vmem>>, vector<1x256xf32>
    %11 = vector.shape_cast %10 : vector<1x256xf32> to vector<1x256xf32>
    %12 = vector.broadcast %11 : vector<1x256xf32> to vector<8x256xf32>
    %13 = arith.truncf %8 : vector<8x256xf32> to vector<8x256xbf16>
    %cst_10 = arith.constant dense<0.000000e+00> : vector<8x256xf32>
    %14 = tpu.matmul %13, %9, %cst_10 {dimension_numbers = #tpu.dot_dimension_numbers<[1], [0], [0], [1], [0, 0, 1, 1], [], []>} : vector<8x256xbf16>, vector<256x256xbf16>, vector<8x256xf32> -> vector<8x256xf32>
    %15 = arith.addf %14, %12 : vector<8x256xf32>
    %cst_11 = arith.constant 0.000000e+00 : f32
    %16 = vector.broadcast %cst_11 : f32 to vector<8x256xf32>
    %17 = arith.maximumf %15, %16 : vector<8x256xf32>
    %18 = arith.truncf %17 : vector<8x256xf32> to vector<8x256xbf16>
    %cst_12 = arith.constant dense<0.000000e+00> : vector<8x256xf32>
    %19 = tpu.matmul %18, %9, %cst_12 {dimension_numbers = #tpu.dot_dimension_numbers<[1], [0], [0], [1], [0, 0, 1, 1], [], []>} : vector<8x256xbf16>, vector<256x256xbf16>, vector<8x256xf32> -> vector<8x256xf32>
    %20 = arith.addf %19, %12 : vector<8x256xf32>
    %cst_13 = arith.constant 0.000000e+00 : f32
    %21 = vector.broadcast %cst_13 : f32 to vector<8x256xf32>
    %22 = arith.maximumf %20, %21 : vector<8x256xf32>
    %23 = arith.truncf %22 : vector<8x256xf32> to vector<8x256xbf16>
    %cst_14 = arith.constant dense<0.000000e+00> : vector<8x256xf32>
    %24 = tpu.matmul %23, %9, %cst_14 {dimension_numbers = #tpu.dot_dimension_numbers<[1], [0], [0], [1], [0, 0, 1, 1], [], []>} : vector<8x256xbf16>, vector<256x256xbf16>, vector<8x256xf32> -> vector<8x256xf32>
    %25 = arith.addf %24, %12 : vector<8x256xf32>
    %cst_15 = arith.constant 0.000000e+00 : f32
    %26 = vector.broadcast %cst_15 : f32 to vector<8x256xf32>
    %27 = arith.maximumf %25, %26 : vector<8x256xf32>
    %28 = arith.truncf %27 : vector<8x256xf32> to vector<8x256xbf16>
    %c0_16 = arith.constant 0 : index
    %c0_17 = arith.constant 0 : index
    %c0_18 = arith.constant 0 : index
    %29 = vector.load %arg7[%c0_16, %c0_17, %c0_18] : memref<1x256x128xbf16, #tpu.memory_space<vmem>>, vector<1x256x128xbf16>
    %30 = vector.shape_cast %29 : vector<1x256x128xbf16> to vector<256x128xbf16>
    %cst_19 = arith.constant dense<0.000000e+00> : vector<8x128xf32>
    %31 = tpu.matmul %28, %30, %cst_19 {dimension_numbers = #tpu.dot_dimension_numbers<[1], [0], [0], [1], [0, 0, 1, 1], [], []>} : vector<8x256xbf16>, vector<256x128xbf16>, vector<8x128xf32> -> vector<8x128xf32>
    %c0_20 = arith.constant 0 : index
    %c0_21 = arith.constant 0 : index
    %c0_22 = arith.constant 0 : index
    %32 = vector.load %arg8[%c0_20, %c0_21, %c0_22] : memref<1x1x128xf32, #tpu.memory_space<vmem>>, vector<1x1x128xf32>
    %33 = vector.shape_cast %32 : vector<1x1x128xf32> to vector<1x128xf32>
    %34 = vector.broadcast %33 : vector<1x128xf32> to vector<8x128xf32>
    %35 = arith.addf %31, %34 : vector<8x128xf32>
    %c0_23 = arith.constant 0 : index
    %c0_24 = arith.constant 0 : index
    %36 = vector.load %arg9[%c0_23, %c0_24] : memref<8x128xf32, #tpu.memory_space<vmem>>, vector<8x128xf32>
    tpu.vector_store %arg9[%c0_23, %c0_24], %35 {strides = array<i32>} : memref<8x128xf32, #tpu.memory_space<vmem>>, vector<8x128xf32>,
    return
  }
  func.func @transform_0(%arg0: i32, %arg1: memref<1xi32, #tpu.memory_space<smem>>) -> (i32, i32) {
    %c0_i32 = arith.constant 0 : i32
    %c0_i32_0 = arith.constant 0 : i32
    return %arg0, %c0_i32 : i32, i32
  }
  func.func @transform_1(%arg0: i32, %arg1: memref<1xi32, #tpu.memory_space<smem>>) -> (i32, i32) {
    %c0_i32 = arith.constant 0 : i32
    %c0_i32_0 = arith.constant 0 : i32
    %c0_i32_1 = arith.constant 0 : i32
    return %c0_i32, %c0_i32_0 : i32, i32
  }
  func.func @transform_2(%arg0: i32, %arg1: memref<1xi32, #tpu.memory_space<smem>>) -> (i32, i32) {
    %c0_i32 = arith.constant 0 : i32
    %c0_i32_0 = arith.constant 0 : i32
    %c0_i32_1 = arith.constant 0 : i32
    return %c0_i32, %c0_i32_0 : i32, i32
  }
  func.func @transform_3(%arg0: i32, %arg1: memref<1xi32, #tpu.memory_space<smem>>) -> (i32, i32) {
    %c0_i32 = arith.constant 0 : i32
    %c0_i32_0 = arith.constant 0 : i32
    %c0_i32_1 = arith.constant 0 : i32
    return %c0_i32, %c0_i32_0 : i32, i32
  }
  func.func @transform_4(%arg0: i32, %arg1: memref<1xi32, #tpu.memory_space<smem>>) -> (i32, i32) {
    %c0_i32 = arith.constant 0 : i32
    %c0_i32_0 = arith.constant 0 : i32
    %c0_i32_1 = arith.constant 0 : i32
    return %c0_i32, %c0_i32_0 : i32, i32
  }
  func.func @transform_5(%arg0: i32, %arg1: memref<1xi32, #tpu.memory_space<smem>>) -> (i32, i32, i32) {
    %c0 = arith.constant 0 : index
    %0 = memref.load %arg1[%c0] : memref<1xi32, #tpu.memory_space<smem>>
    %c0_i32 = arith.constant 0 : i32
    %c0_i32_0 = arith.constant 0 : i32
    %c0_i32_1 = arith.constant 0 : i32
    return %0, %c0_i32, %c0_i32_0 : i32, i32, i32
  }
  func.func @transform_6(%arg0: i32, %arg1: memref<1xi32, #tpu.memory_space<smem>>) -> (i32, i32, i32) {
    %c0 = arith.constant 0 : index
    %0 = memref.load %arg1[%c0] : memref<1xi32, #tpu.memory_space<smem>>
    %c0_i32 = arith.constant 0 : i32
    %c0_i32_0 = arith.constant 0 : i32
    %c0_i32_1 = arith.constant 0 : i32
    return %0, %c0_i32, %c0_i32_0 : i32, i32, i32
  }
  func.func @transform_7(%arg0: i32, %arg1: memref<1xi32, #tpu.memory_space<smem>>) -> (i32, i32) {
    %c0_i32 = arith.constant 0 : i32
    %c0_i32_0 = arith.constant 0 : i32
    return %arg0, %c0_i32 : i32, i32
  }
}

</mosaic_0001>

<bundles_post_ra>
// kernel: tpu_custom_call.1
= control target key start
LH: loop header
LB: loop body
LE: loop exit
PB: predicated region body
PF: predicated region fallthrough
CT: control target
= control target key end

     0   :  { %14 = vsyncpa [#allocation5], 0  ;;  %s2259_s0 = inlined_call_operand.<no memory space> [shape: s32[1], index: 0, kind: input, shape index: {}]   ;;  %s2260_s1 = inlined_call_operand.hbm [shape: f32[8,784], index: 1, kind: input, shape index: {}]   ;;  %s2261_s2 = inlined_call_operand.hbm [shape: bf16[784,256], index: 2, kind: input, shape index: {}]   ;;  %s2262_s3 = inlined_call_operand.vmem [shape: f32[1,256], index: 3, kind: input, shape index: {}]   ;;  %s2263_s4 = inlined_call_operand.hbm [shape: bf16[256,256], index: 4, kind: input, shape index: {}]   ;;  %s2264_s5 = inlined_call_operand.vmem [shape: f32[1,256], index: 5, kind: input, shape index: {}]   ;;  %s2265_s6 = inlined_call_operand.hbm [shape: bf16[5,256,128], index: 6, kind: input, shape index: {}]   ;;  %s2266_s7 = inlined_call_operand.vmem [shape: f32[5,1,128], index: 7, kind: input, shape index: {}]   ;;  %s2267_s8 = inlined_call_operand.hbm [shape: f32[8,128], index: 8, kind: output, shape index: {}]  }
   0x1   :  { %15 = vsyncpa [#allocation8], 0 }
   0x2   :  { %16 = vsyncpa [#allocation11], 0 }
   0x3   :  { %17 = vsyncpa [#allocation6], 0  ;;  %s1953_s27 = smov [#allocation7]   ;;  %s1833_s9 = scalar_lea.hbm %s2261_s2, 12544 }
   0x4   :  { %s33_s28 = sshll.u32 %s1953_s27, 4  ;;  %p1834_p0 = scmp.ne.s32.totalorder %s2261_s2, %s1833_s9  ;;  %s34_s28 = int_to_ptr.vmem [resolvable:$true] %s33_s28 }
   0x5   :  { %p1837_p1 = scmp.lt.u32.totalorder %s1833_s9, %s2261_s2 }
   0x7   :  { %p1839_p2 = pnand %p1837_p1, %p1834_p0 }
   0x9   :  { %1842 = shalt.err (!%p1839_p2)
}
   0xa   :  { %s1843_s14 = scalar_lea.vmem %s34_s28, 12544  ;;  %p1848_p4 = scmp.lt.s32.totalorder %s34_s28, %s34_s28 }
   0xb   :  { %p1844_p3 = scmp.ne.s32.totalorder %s34_s28, %s1843_s14  ;;  %p1849_p5 = scmp.lt.s32.totalorder %s1843_s14, %s1843_s14 }
   0xd   :  { %p1850_p6 = por %p1849_p5, %p1848_p4 }
   0xf   :  { %p1851_p7 = pnand %p1850_p6, %p1844_p3 }
  0x11   :  { %1854 = shalt.err (!%p1851_p7)
}
  0x12   :  { %s1954_s15 = smov 128   ;;  %s1955_s16 = smov 8  }
  0x13   :  { %39 = dma.hbm_to_vmem [thread:$0]  %s2261_s2, 12544, %s34_s28, [#allocation8], %s1954_s15, %s1954_s15, %s1955_s16  }
  0x14   :  { %s1956_s19 = smov [#allocation4]   ;;  %s1957_s21 = smov [#allocation9]  }
  0x15   :  { %s24_s20 = sshll.u32 %s1956_s19, 4  ;;  %s47_s22 = sshll.u32 %s1957_s21, 4  ;;  %s25_s20 = int_to_ptr.vmem [resolvable:$true] %s24_s20  ;;  %s48_s22 = int_to_ptr.vmem [resolvable:$true] %s47_s22 }
  0x16   :  { %s1855_s25 = scalar_lea.hbm %s2260_s1, 896 }
  0x17   :  { %p1856_p8 = scmp.ne.s32.totalorder %s2260_s1, %s1855_s25  ;;  %p1859_p9 = scmp.lt.u32.totalorder %s1855_s25, %s2260_s1 }
  0x19   :  { %p1861_p10 = pnand %p1859_p9, %p1856_p8 }
  0x1b   :  { %1864 = shalt.err (!%p1861_p10)
}
  0x1c   :  { %s1865_s2 = scalar_lea.vmem %s25_s20, 896  ;;  %p1870_p12 = scmp.lt.s32.totalorder %s25_s20, %s25_s20 }
  0x1d   :  { %p1866_p11 = scmp.ne.s32.totalorder %s25_s20, %s1865_s2  ;;  %p1871_p13 = scmp.lt.s32.totalorder %s1865_s2, %s1865_s2 }
  0x1f   :  { %p1872_p0 = por %p1871_p13, %p1870_p12 }
  0x21   :  { %p1873_p1 = pnand %p1872_p0, %p1866_p11 }
  0x23   :  { %1876 = shalt.err (!%p1873_p1)
}
  0x24   :  { %27 = dma.hbm_to_vmem [thread:$0]  %s2260_s1, 896, %s25_s20, [#allocation5]  }
  0x25   :  { %s1575_s12 = sshll.u32 %s2259_s0, 11  ;;  %s1877_s17 = scalar_lea.hbm %s2263_s4, 4096 }
  0x26   :  { %p1878_p2 = scmp.ne.s32.totalorder %s2263_s4, %s1877_s17  ;;  %p1881_p3 = scmp.lt.u32.totalorder %s1877_s17, %s2263_s4 }
  0x28   :  { %p1883_p4 = pnand %p1881_p3, %p1878_p2 }
  0x2a   :  { %1886 = shalt.err (!%p1883_p4)
}
  0x2b   :  { %s1887_s1 = scalar_lea.vmem %s48_s22, 4096  ;;  %p1892_p6 = scmp.lt.s32.totalorder %s48_s22, %s48_s22 }
  0x2c   :  { %p1888_p5 = scmp.ne.s32.totalorder %s48_s22, %s1887_s1  ;;  %p1893_p7 = scmp.lt.s32.totalorder %s1887_s1, %s1887_s1 }
  0x2e   :  { %p1894_p8 = por %p1893_p7, %p1892_p6 }
  0x30   :  { %p1895_p9 = pnand %p1894_p8, %p1888_p5 }
  0x32   :  { %1898 = shalt.err (!%p1895_p9)
}
  0x33   :  { %53 = dma.hbm_to_vmem [thread:$0]  %s2263_s4, 4096, %s48_s22, [#allocation8], %s1954_s15, %s1954_s15, %s1955_s16  }
  0x34   :  { %s64_s27 = scalar_lea.hbm %s2265_s6, %s1575_s12  ;;  %s1958_s29 = smov [#allocation10]  }
  0x35   :  { %s65_s30 = sshll.u32 %s1958_s29, 4  ;;  %s1899_s2 = scalar_lea.hbm %s64_s27, 2048  ;;  %s66_s30 = int_to_ptr.vmem [resolvable:$true] %s65_s30 }
  0x36   :  { %p1900_p10 = scmp.ne.s32.totalorder %s64_s27, %s1899_s2  ;;  %s1901_s10 = scalar_lea.hbm %s2265_s6, 10240 }
  0x37   :  { %p1902_p11 = scmp.lt.u32.totalorder %s64_s27, %s2265_s6  ;;  %p1903_p12 = scmp.lt.u32.totalorder %s1901_s10, %s1899_s2 }
  0x38   :  { %p1905_p0 = scmp.lt.u32.totalorder %s1899_s2, %s64_s27 }
  0x39   :  { %p1904_p13 = por %p1903_p12, %p1902_p11 }
  0x3b   :  { %p1906_p1 = por %p1905_p0, %p1904_p13 }
  0x3d   :  { %p1907_p2 = pnand %p1906_p1, %p1900_p10 }
  0x3f   :  { %1910 = shalt.err (!%p1907_p2)
}
  0x40   :  { %s1911_s4 = scalar_lea.vmem %s66_s30, 2048  ;;  %p1916_p4 = scmp.lt.s32.totalorder %s66_s30, %s66_s30 }
  0x41   :  { %p1912_p3 = scmp.ne.s32.totalorder %s66_s30, %s1911_s4  ;;  %p1917_p5 = scmp.lt.s32.totalorder %s1911_s4, %s1911_s4 }
  0x43   :  { %p1918_p6 = por %p1917_p5, %p1916_p4 }
  0x45   :  { %p1919_p7 = pnand %p1918_p6, %p1912_p3 }
  0x47   :  { %1922 = shalt.err (!%p1919_p7)
}
  0x48   :  { %s1959_s15 = smov 64   ;;  %s1960_s16 = smov 4  }
  0x49   :  { %71 = dma.hbm_to_vmem [thread:$0]  %s64_s27, 2048, %s66_s30, [#allocation11], %s1959_s15, %s1959_s15, %s1960_s16  }
  0x4a   :  { %1945 = dma.done.wait [#allocation5], 896  }
  0x4b   :  { %1946 = vsyncadd [#allocation5], 4294966400 }
  0x4c   :  { %1947 = dma.done.wait [#allocation8], 16640  }
  0x4d   :  { %1948 = vsyncadd [#allocation8], 4294950656 }
  0x4e   :  { %1949 = dma.done.wait [#allocation11], 2048  }
  0x4f   :  { %1950 = vsyncadd [#allocation11], 4294965248  ;;  %v1622_v0 = vld [vmem:[#allocation7 + $0x4] ss:$8 sps:$4 sm:$0xff]   ;;  %v1624_v1 = vld [vmem:[#allocation7] ss:$8 sps:$4 sm:$0xff]  }
  0x50   :  { %720 = vmatprep.subr.bf16.mxu0 %v1622_v0  ;;  %v1625_v2 = vld [vmem:[#allocation7 + $0x14] ss:$8 sps:$4 sm:$0xff]   ;;  %v1627_v3 = vld [vmem:[#allocation7 + $0x10] ss:$8 sps:$4 sm:$0xff]   ;;  %v1628_v4 = vld [vmem:[#allocation7 + $0x24] ss:$8 sps:$4 sm:$0xff]  }
  0x51   :  { %721 = vmatpush1.bf16.msra.mxu0 %v1624_v1  ;;  %v1630_v5 = vld [vmem:[#allocation7 + $0x20] ss:$8 sps:$4 sm:$0xff]   ;;  %v1631_v6 = vld [vmem:[#allocation7 + $0x34] ss:$8 sps:$4 sm:$0xff]   ;;  %v1633_v7 = vld [vmem:[#allocation7 + $0x30] ss:$8 sps:$4 sm:$0xff]  }
  0x52   :  { %722 = vmatprep.subr.bf16.mxu0 %v1625_v2  ;;  %v1634_v8 = vld [vmem:[#allocation7 + $0x44] ss:$8 sps:$4 sm:$0xff]   ;;  %v1636_v9 = vld [vmem:[#allocation7 + $0x40] ss:$8 sps:$4 sm:$0xff]   ;;  %v1637_v10 = vld [vmem:[#allocation7 + $0x54] ss:$8 sps:$4 sm:$0xff]  }
  0x53   :  { %v1639_v11 = vld [vmem:[#allocation7 + $0x50] ss:$8 sps:$4 sm:$0xff]   ;;  %v1640_v12 = vld [vmem:[#allocation7 + $0x64] ss:$8 sps:$4 sm:$0xff]   ;;  %v1642_v15 = vld [vmem:[#allocation7 + $0x60] ss:$8 sps:$4 sm:$0xff]  }
  0x54   :  { %v103_v13 = vld [vmem:[#allocation4 + $0x8] sm:$0xff]  ;;  %v1646_v18 = vld [vmem:[#allocation7 + $0x84] ss:$8 sps:$4 sm:$0xff]   ;;  %v1648_v19 = vld [vmem:[#allocation7 + $0x80] ss:$8 sps:$4 sm:$0xff]   ;;  %vm716_vm0 = vcmask 130048  }
  0x55   :  { %723 = vmatpush1.bf16.msra.mxu0 %v1627_v3  ;;  %v110_v14 = vpack.c.bf16 %v103_v13, %v103_v13  ;;  %v1643_v16 = vld [vmem:[#allocation7 + $0x74] ss:$8 sps:$4 sm:$0xff]   ;;  %v1645_v17 = vld [vmem:[#allocation7 + $0x70] ss:$8 sps:$4 sm:$0xff]   ;;  %v1652_v22 = vld [vmem:[#allocation7 + $0xa4] ss:$8 sps:$4 sm:$0xff]  }
  0x56   :  { %724 = vmatprep.subr.bf16.mxu0 %v1628_v4  ;;  %v1649_v20 = vld [vmem:[#allocation7 + $0x94] ss:$8 sps:$4 sm:$0xff]   ;;  %v1651_v21 = vld [vmem:[#allocation7 + $0x90] ss:$8 sps:$4 sm:$0xff]   ;;  %v1654_v23 = vld [vmem:[#allocation7 + $0xa0] ss:$8 sps:$4 sm:$0xff]  }
  0x57   :  { %752 = vmatprep.mubr.bf16.mxu0 %v110_v14  ;;  %v1655_v24 = vld [vmem:[#allocation7 + $0xb4] ss:$8 sps:$4 sm:$0xff]   ;;  %v1657_v25 = vld [vmem:[#allocation7 + $0xb0] ss:$8 sps:$4 sm:$0xff]   ;;  %v1658_v26 = vld [vmem:[#allocation7 + $0xc4] ss:$8 sps:$4 sm:$0xff]  }
  0x58   :  { %v1660_v27 = vld [vmem:[#allocation7 + $0xc0] ss:$8 sps:$4 sm:$0xff]   ;;  %v1661_v28 = vld [vmem:[#allocation7 + $0xd4] ss:$8 sps:$4 sm:$0xff]   ;;  %v1663_v29 = vld [vmem:[#allocation7 + $0xd0] ss:$8 sps:$4 sm:$0xff]  }
  0x59   :  { %725 = vmatpush1.bf16.msra.mxu0 %v1630_v5  ;;  %v1664_v30 = vld [vmem:[#allocation7 + $0xe4] ss:$8 sps:$4 sm:$0xff]   ;;  %v1666_v31 = vld [vmem:[#allocation7 + $0xe0] ss:$8 sps:$4 sm:$0xff]   ;;  %v1667_v32 = vld [vmem:[#allocation7 + $0xf4] ss:$8 sps:$4 sm:$0xff]  }
  0x5a   :  { %726 = vmatprep.subr.bf16.mxu0 %v1631_v6  ;;  %v1669_v33 = vld [vmem:[#allocation7 + $0xf0] ss:$8 sps:$4 sm:$0xff]   ;;  %v1672_v34 = vld [vmem:[#allocation7 + $0x104] ss:$8 sps:$4 sm:$0xff]   ;;  %v1670_v38 = vld [vmem:[#allocation7 + $0x100] ss:$8 sps:$4 sm:$0xff]  }
  0x5b   :  { %v102_v35 = vld [vmem:[#allocation4] sm:$0xff]  ;;  %v105_v36 = vld [vmem:[#allocation4 + $0x18] sm:$0xff]  ;;  %v1675_v40 = vld [vmem:[#allocation7 + $0x114] ss:$8 sps:$4 sm:$0xff]   ;;  %p97_p8 = scmp.lt.s32.totalorder %s2259_s0, 4  ;;  %s1962_s1 = smov [#allocation12]  }
  0x5c   :  { %v109_v37 = vpack.c.bf16 %v102_v35, %v102_v35  ;;  %v112_v39 = vpack.c.bf16 %v105_v36, %v105_v36  ;;  %v1673_v41 = vld [vmem:[#allocation7 + $0x110] ss:$8 sps:$4 sm:$0xff]   ;;  %v1678_v42 = vld [vmem:[#allocation7 + $0x124] ss:$8 sps:$4 sm:$0xff]   ;;  %v1676_v43 = vld [vmem:[#allocation7 + $0x120] ss:$8 sps:$4 sm:$0xff]  }
  0x5d   :  { %727 = vmatpush1.bf16.msra.mxu0 %v1633_v7  ;;  %v1681_v44 = vld [vmem:[#allocation7 + $0x134] ss:$8 sps:$4 sm:$0xff]   ;;  %v1679_v45 = vld [vmem:[#allocation7 + $0x130] ss:$8 sps:$4 sm:$0xff]   ;;  %v1684_v46 = vld [vmem:[#allocation7 + $0x144] ss:$8 sps:$4 sm:$0xff]  }
  0x5e   :  { %728 = vmatprep.subr.bf16.mxu0 %v1634_v8  ;;  %v2062_v47 = vld [vmem:[#allocation9 + $0x4] ss:$8 sps:$4 sm:$0xff]   ;;  %v2064_v48 = vld [vmem:[#allocation9] ss:$8 sps:$4 sm:$0xff]   ;;  %v2066_v49 = vld [vmem:[#allocation9 + $0x14] ss:$8 sps:$4 sm:$0xff]  }
  0x5f   :  { %v1682_v50 = vld [vmem:[#allocation7 + $0x140] ss:$8 sps:$4 sm:$0xff]   ;;  %v1687_v51 = vld [vmem:[#allocation7 + $0x154] ss:$8 sps:$4 sm:$0xff]   ;;  %1092 = vmatprep.subr.bf16.mxu1 %v2062_v47  ;;  %v1685_v54 = vld [vmem:[#allocation7 + $0x150] ss:$8 sps:$4 sm:$0xff]  }
  0x60   :  { %1093 = vmatpush1.bf16.msra.mxu1 %v2064_v48  ;;  %v2070_v52 = vld [vmem:[#allocation9 + $0x10] ss:$8 sps:$4 sm:$0xff]   ;;  %v2073_v53 = vld [vmem:[#allocation9 + $0x24] ss:$8 sps:$4 sm:$0xff]   ;;  %v1690_v55 = vld [vmem:[#allocation7 + $0x164] ss:$8 sps:$4 sm:$0xff]  }
  0x61   :  { %729 = vmatpush1.bf16.msra.mxu0 %v1636_v9  ;;  %1094 = vmatprep.subr.bf16.mxu1 %v2066_v49  ;;  %v2076_v56 = vld [vmem:[#allocation9 + $0x20] ss:$8 sps:$4 sm:$0xff]   ;;  %v1688_v57 = vld [vmem:[#allocation7 + $0x160] ss:$8 sps:$4 sm:$0xff]   ;;  %v2079_v58 = vld [vmem:[#allocation9 + $0x34] ss:$8 sps:$4 sm:$0xff]  }
  0x62   :  { %730 = vmatprep.subr.bf16.mxu0 %v1637_v10  ;;  %v1693_v59 = vld [vmem:[#allocation7 + $0x174] ss:$8 sps:$4 sm:$0xff]   ;;  %v2081_v60 = vld [vmem:[#allocation9 + $0x30] ss:$8 sps:$4 sm:$0xff]   ;;  %v1691_v61 = vld [vmem:[#allocation7 + $0x170] ss:$8 sps:$4 sm:$0xff]  }
  0x63   :  { %v2084_v62 = vld [vmem:[#allocation9 + $0x44] ss:$8 sps:$4 sm:$0xff]   ;;  %v1696_v63 = vld [vmem:[#allocation7 + $0x184] ss:$8 sps:$4 sm:$0xff]   ;;  %v2087_v0 = vld [vmem:[#allocation9 + $0x40] ss:$8 sps:$4 sm:$0xff]  }
  0x64   :  { %1095 = vmatpush1.bf16.msra.mxu1 %v2070_v52  ;;  %v2089_v1 = vld [vmem:[#allocation9 + $0x54] ss:$8 sps:$4 sm:$0xff]   ;;  %v1694_v2 = vld [vmem:[#allocation7 + $0x180] ss:$8 sps:$4 sm:$0xff]   ;;  %v1699_v3 = vld [vmem:[#allocation7 + $0x194] ss:$8 sps:$4 sm:$0xff]  }
  0x65   :  { %731 = vmatpush1.bf16.msra.mxu0 %v1639_v11  ;;  %1096 = vmatprep.subr.bf16.mxu1 %v2073_v53  ;;  %v2093_v4 = vld [vmem:[#allocation9 + $0x50] ss:$8 sps:$4 sm:$0xff]   ;;  %v2095_v5 = vld [vmem:[#allocation9 + $0x64] ss:$8 sps:$4 sm:$0xff]   ;;  %v1697_v6 = vld [vmem:[#allocation7 + $0x190] ss:$8 sps:$4 sm:$0xff]  }
  0x66   :  { %732 = vmatprep.subr.bf16.mxu0 %v1640_v12  ;;  %v1702_v7 = vld [vmem:[#allocation7 + $0x1a4] ss:$8 sps:$4 sm:$0xff]   ;;  %v2100_v8 = vld [vmem:[#allocation9 + $0x60] ss:$8 sps:$4 sm:$0xff]   ;;  %v1700_v10 = vld [vmem:[#allocation7 + $0x1a0] ss:$8 sps:$4 sm:$0xff]  }
  0x67   :  { %v2103_v9 = vld [vmem:[#allocation9 + $0x74] ss:$8 sps:$4 sm:$0xff]   ;;  %v1705_v11 = vld [vmem:[#allocation7 + $0x1b4] ss:$8 sps:$4 sm:$0xff]   ;;  %v2106_v12 = vld [vmem:[#allocation9 + $0x70] ss:$8 sps:$4 sm:$0xff]  }
  0x68   :  { %1097 = vmatpush1.bf16.msra.mxu1 %v2076_v56  ;;  %v2109_v13 = vld [vmem:[#allocation9 + $0x84] ss:$8 sps:$4 sm:$0xff]   ;;  %v1703_v14 = vld [vmem:[#allocation7 + $0x1b0] ss:$8 sps:$4 sm:$0xff]   ;;  %v2139_v36 = vld [vmem:[#allocation9 + $0xd4] ss:$8 sps:$4 sm:$0xff]  }
  0x69   :  { %733 = vmatpush1.bf16.msra.mxu0 %v1642_v15  ;;  %1098 = vmatprep.subr.bf16.mxu1 %v2079_v58  ;;  %v1708_v15 = vld [vmem:[#allocation7 + $0x1c4] ss:$8 sps:$4 sm:$0xff]   ;;  %s2269_s0 = smov (!%p97_p8, %s2259_s0), 4  ;;  %s1409_s20 = sshll.u32 %s1962_s1, 4  ;;  %s1410_s20 = int_to_ptr.vmem [resolvable:$true] %s1409_s20 }
  0x6a   :  { %734 = vmatprep.subr.bf16.mxu0 %v1643_v16  ;;  %v2112_v16 = vld [vmem:[#allocation9 + $0x80] ss:$8 sps:$4 sm:$0xff]   ;;  %s99_s23 = scalar_lea.vmem %s2266_s7, %s2269_s0  ;;  %s1923_s24 = scalar_lea.vmem %s1410_s20, 128 }
  0x6b   :  { %p1924_p9 = scmp.ne.s32.totalorder %s1410_s20, %s1923_s24  ;;  %p1928_p10 = scmp.lt.s32.totalorder %s1410_s20, %s1410_s20 }
  0x6c   :  { %1099 = vmatpush1.bf16.msra.mxu1 %v2081_v60  ;;  %p1929_p11 = scmp.lt.s32.totalorder %s1923_s24, %s1923_s24 }
  0x6d   :  { %735 = vmatpush1.bf16.msra.mxu0 %v1645_v17  ;;  %1100 = vmatprep.subr.bf16.mxu1 %v2084_v62  ;;  %v2115_v17 = vld [vmem:[#allocation9 + $0x94] ss:$8 sps:$4 sm:$0xff]  }
  0x6e   :  { %736 = vmatprep.subr.bf16.mxu0 %v1646_v18  ;;  %v1706_v18 = vld [vmem:[#allocation7 + $0x1c0] ss:$8 sps:$4 sm:$0xff]   ;;  %p1930_p12 = por %p1929_p11, %p1928_p10 }
  0x70   :  { %1101 = vmatpush1.bf16.msra.mxu1 %v2087_v0  ;;  %p1931_p13 = pnand %p1930_p12, %p1924_p9 }
  0x71   :  { %737 = vmatpush1.bf16.msra.mxu0 %v1648_v19  ;;  %1102 = vmatprep.subr.bf16.mxu1 %v2089_v1  ;;  %v1711_v19 = vld [vmem:[#allocation7 + $0x1d4] ss:$8 sps:$4 sm:$0xff]  }
  0x72   :  { %738 = vmatprep.subr.bf16.mxu0 %v1649_v20  ;;  %v2118_v20 = vld [vmem:[#allocation9 + $0x90] ss:$8 sps:$4 sm:$0xff]  }
  0x74   :  { %1103 = vmatpush1.bf16.msra.mxu1 %v2093_v4 }
  0x75   :  { %739 = vmatpush1.bf16.msra.mxu0 %v1651_v21  ;;  %1104 = vmatprep.subr.bf16.mxu1 %v2095_v5  ;;  %v2121_v21 = vld [vmem:[#allocation9 + $0xa4] ss:$8 sps:$4 sm:$0xff]  }
  0x76   :  { %740 = vmatprep.subr.bf16.mxu0 %v1652_v22  ;;  %v1709_v22 = vld [vmem:[#allocation7 + $0x1d0] ss:$8 sps:$4 sm:$0xff]  }
  0x78   :  { %1105 = vmatpush1.bf16.msra.mxu1 %v2100_v8 }
  0x79   :  { %741 = vmatpush1.bf16.msra.mxu0 %v1654_v23  ;;  %1106 = vmatprep.subr.bf16.mxu1 %v2103_v9  ;;  %v1714_v23 = vld [vmem:[#allocation7 + $0x1e4] ss:$8 sps:$4 sm:$0xff]  }
  0x7a   :  { %742 = vmatprep.subr.bf16.mxu0 %v1655_v24  ;;  %v2124_v24 = vld [vmem:[#allocation9 + $0xa0] ss:$8 sps:$4 sm:$0xff]  }
  0x7c   :  { %1107 = vmatpush1.bf16.msra.mxu1 %v2106_v12 }
  0x7d   :  { %743 = vmatpush1.bf16.msra.mxu0 %v1657_v25  ;;  %1108 = vmatprep.subr.bf16.mxu1 %v2109_v13  ;;  %v2127_v25 = vld [vmem:[#allocation9 + $0xb4] ss:$8 sps:$4 sm:$0xff]  }
  0x7e   :  { %744 = vmatprep.subr.bf16.mxu0 %v1658_v26  ;;  %v1712_v26 = vld [vmem:[#allocation7 + $0x1e0] ss:$8 sps:$4 sm:$0xff]  }
  0x80   :  { %1109 = vmatpush1.bf16.msra.mxu1 %v2112_v16 }
  0x81   :  { %745 = vmatpush1.bf16.msra.mxu0 %v1660_v27  ;;  %1110 = vmatprep.subr.bf16.mxu1 %v2115_v17  ;;  %v1717_v27 = vld [vmem:[#allocation7 + $0x1f4] ss:$8 sps:$4 sm:$0xff]  }
  0x82   :  { %746 = vmatprep.subr.bf16.mxu0 %v1661_v28  ;;  %v2130_v28 = vld [vmem:[#allocation9 + $0xb0] ss:$8 sps:$4 sm:$0xff]  }
  0x84   :  { %1111 = vmatpush1.bf16.msra.mxu1 %v2118_v20 }
  0x85   :  { %747 = vmatpush1.bf16.msra.mxu0 %v1663_v29  ;;  %1112 = vmatprep.subr.bf16.mxu1 %v2121_v21  ;;  %v2133_v29 = vld [vmem:[#allocation9 + $0xc4] ss:$8 sps:$4 sm:$0xff]  }
  0x86   :  { %748 = vmatprep.subr.bf16.mxu0 %v1664_v30  ;;  %v1715_v30 = vld [vmem:[#allocation7 + $0x1f0] ss:$8 sps:$4 sm:$0xff]  }
  0x88   :  { %1113 = vmatpush1.bf16.msra.mxu1 %v2124_v24 }
  0x89   :  { %749 = vmatpush1.bf16.msra.mxu0 %v1666_v31  ;;  %1114 = vmatprep.subr.bf16.mxu1 %v2127_v25  ;;  %v104_v31 = vld [vmem:[#allocation4 + $0x10] sm:$0xff] }
  0x8a   :  { %750 = vmatprep.subr.bf16.mxu0 %v1667_v32  ;;  %v1720_v32 = vld [vmem:[#allocation7 + $0x204] ss:$8 sps:$4 sm:$0xff]   ;;  %v111_v35 = vpack.c.bf16 %v104_v31, %v104_v31 }
  0x8b   :  { %v106_v31 = vld [vmem:[#allocation4 + $0x20] sm:$0xff] }
  0x8c   :  { %1115 = vmatpush1.bf16.msra.mxu1 %v2130_v28 }
  0x8d   :  { %751 = vmatpush1.bf16.msra.mxu0 %v1669_v33  ;;  %v107_v33 = vld [vmem:[#allocation4 + $0x28] sm:$0xff]  ;;  %1116 = vmatprep.subr.bf16.mxu1 %v2133_v29 }
  0x8e   :  { %761 = vmatprep.subr.bf16.mxu0 %v1672_v34  ;;  %v2136_v34 = vld [vmem:[#allocation9 + $0xc0] ss:$8 sps:$4 sm:$0xff]  }
  0x90   :  { %753 = vmatmul.mubr.bf16.vlgmr.msra.gmra.mrb[0].mxu0 %v109_v37  ;;  %v1718_v37 = vld [vmem:[#allocation7 + $0x200] ss:$8 sps:$4 sm:$0xff]   ;;  %1117 = vmatpush1.bf16.msra.mxu1 %v2136_v34 }
  0x91   :  { %762 = vmatpush1.bf16.msra.mxu0 %v1670_v38  ;;  %793 = vmatprep.mubr.bf16.mxu0 %v112_v39  ;;  %v114_v38 = vpack.c.bf16 %v107_v33, %v107_v33  ;;  %v1723_v39 = vld [vmem:[#allocation7 + $0x214] ss:$8 sps:$4 sm:$0xff]   ;;  %v113_v33 = vpack.c.bf16 %v106_v31, %v106_v31 }
  0x92   :  { %763 = vmatprep.subr.bf16.mxu0 %v1675_v40  ;;  %v2142_v40 = vld [vmem:[#allocation9 + $0xd0] ss:$8 sps:$4 sm:$0xff]   ;;  %1118 = vmatprep.subr.bf16.mxu1 %v2139_v36 }
  0x94   :  { %1119 = vmatpush1.bf16.msra.mxu1 %v2142_v40 }
  0x95   :  { %764 = vmatpush1.bf16.msra.mxu0 %v1673_v41  ;;  %v1721_v41 = vld [vmem:[#allocation7 + $0x210] ss:$8 sps:$4 sm:$0xff]  }
  0x96   :  { %765 = vmatprep.subr.bf16.mxu0 %v1678_v42  ;;  %v1726_v42 = vld [vmem:[#allocation7 + $0x224] ss:$8 sps:$4 sm:$0xff]  }
  0x99   :  { %766 = vmatpush1.bf16.msra.mxu0 %v1676_v43  ;;  %v1724_v43 = vld [vmem:[#allocation7 + $0x220] ss:$8 sps:$4 sm:$0xff]  }
  0x9a   :  { %767 = vmatprep.subr.bf16.mxu0 %v1681_v44  ;;  %v1729_v44 = vld [vmem:[#allocation7 + $0x234] ss:$8 sps:$4 sm:$0xff]  }
  0x9d   :  { %768 = vmatpush1.bf16.msra.mxu0 %v1679_v45  ;;  %v1727_v45 = vld [vmem:[#allocation7 + $0x230] ss:$8 sps:$4 sm:$0xff]  }
  0x9e   :  { %769 = vmatprep.subr.bf16.mxu0 %v1684_v46  ;;  %v1732_v46 = vld [vmem:[#allocation7 + $0x244] ss:$8 sps:$4 sm:$0xff]  }
  0xa1   :  { %770 = vmatpush1.bf16.msra.mxu0 %v1682_v50  ;;  %v1730_v50 = vld [vmem:[#allocation7 + $0x240] ss:$8 sps:$4 sm:$0xff]  }
  0xa2   :  { %771 = vmatprep.subr.bf16.mxu0 %v1687_v51  ;;  %v1735_v51 = vld [vmem:[#allocation7 + $0x254] ss:$8 sps:$4 sm:$0xff]  }
  0xa5   :  { %772 = vmatpush1.bf16.msra.mxu0 %v1685_v54  ;;  %v1733_v54 = vld [vmem:[#allocation7 + $0x250] ss:$8 sps:$4 sm:$0xff]  }
  0xa6   :  { %773 = vmatprep.subr.bf16.mxu0 %v1690_v55  ;;  %v1738_v55 = vld [vmem:[#allocation7 + $0x264] ss:$8 sps:$4 sm:$0xff]  }
  0xa9   :  { %774 = vmatpush1.bf16.msra.mxu0 %v1688_v57  ;;  %v1736_v57 = vld [vmem:[#allocation7 + $0x260] ss:$8 sps:$4 sm:$0xff]  }
  0xaa   :  { %775 = vmatprep.subr.bf16.mxu0 %v1693_v59  ;;  %v1741_v59 = vld [vmem:[#allocation7 + $0x274] ss:$8 sps:$4 sm:$0xff]  }
  0xad   :  { %776 = vmatpush1.bf16.msra.mxu0 %v1691_v61  ;;  %v1739_v61 = vld [vmem:[#allocation7 + $0x270] ss:$8 sps:$4 sm:$0xff]  }
  0xae   :  { %777 = vmatprep.subr.bf16.mxu0 %v1696_v63  ;;  %v1744_v63 = vld [vmem:[#allocation7 + $0x284] ss:$8 sps:$4 sm:$0xff]  }
  0xb1   :  { %778 = vmatpush1.bf16.msra.mxu0 %v1694_v2  ;;  %v1742_v2 = vld [vmem:[#allocation7 + $0x280] ss:$8 sps:$4 sm:$0xff]  }
  0xb2   :  { %779 = vmatprep.subr.bf16.mxu0 %v1699_v3  ;;  %v1747_v3 = vld [vmem:[#allocation7 + $0x294] ss:$8 sps:$4 sm:$0xff]  }
  0xb5   :  { %780 = vmatpush1.bf16.msra.mxu0 %v1697_v6  ;;  %v1745_v6 = vld [vmem:[#allocation7 + $0x290] ss:$8 sps:$4 sm:$0xff]  }
  0xb6   :  { %781 = vmatprep.subr.bf16.mxu0 %v1702_v7  ;;  %v1750_v7 = vld [vmem:[#allocation7 + $0x2a4] ss:$8 sps:$4 sm:$0xff]  }
  0xb9   :  { %782 = vmatpush1.bf16.msra.mxu0 %v1700_v10  ;;  %v1748_v10 = vld [vmem:[#allocation7 + $0x2a0] ss:$8 sps:$4 sm:$0xff]  }
  0xba   :  { %783 = vmatprep.subr.bf16.mxu0 %v1705_v11  ;;  %v1753_v11 = vld [vmem:[#allocation7 + $0x2b4] ss:$8 sps:$4 sm:$0xff]  }
  0xbd   :  { %784 = vmatpush1.bf16.msra.mxu0 %v1703_v14  ;;  %v1751_v14 = vld [vmem:[#allocation7 + $0x2b0] ss:$8 sps:$4 sm:$0xff]  }
  0xbe   :  { %785 = vmatprep.subr.bf16.mxu0 %v1708_v15  ;;  %v1756_v15 = vld [vmem:[#allocation7 + $0x2c4] ss:$8 sps:$4 sm:$0xff]  }
  0xc1   :  { %786 = vmatpush1.bf16.msra.mxu0 %v1706_v18  ;;  %v1754_v18 = vld [vmem:[#allocation7 + $0x2c0] ss:$8 sps:$4 sm:$0xff]  }
  0xc2   :  { %787 = vmatprep.subr.bf16.mxu0 %v1711_v19  ;;  %v1759_v19 = vld [vmem:[#allocation7 + $0x2d4] ss:$8 sps:$4 sm:$0xff]  }
  0xc5   :  { %788 = vmatpush1.bf16.msra.mxu0 %v1709_v22  ;;  %v1757_v22 = vld [vmem:[#allocation7 + $0x2d0] ss:$8 sps:$4 sm:$0xff]  }
  0xc6   :  { %789 = vmatprep.subr.bf16.mxu0 %v1714_v23  ;;  %v1762_v23 = vld [vmem:[#allocation7 + $0x2e4] ss:$8 sps:$4 sm:$0xff]  }
  0xc9   :  { %790 = vmatpush1.bf16.msra.mxu0 %v1712_v26  ;;  %v1760_v26 = vld [vmem:[#allocation7 + $0x2e0] ss:$8 sps:$4 sm:$0xff]  }
  0xca   :  { %791 = vmatprep.subr.bf16.mxu0 %v1717_v27  ;;  %v1765_v27 = vld [vmem:[#allocation7 + $0x2f4] ss:$8 sps:$4 sm:$0xff]  }
  0xcd   :  { %792 = vmatpush1.bf16.msra.mxu0 %v1715_v30  ;;  %v1763_v30 = vld [vmem:[#allocation7 + $0x2f0] ss:$8 sps:$4 sm:$0xff]  }
  0xce   :  { %802 = vmatprep.subr.bf16.mxu0 %v1720_v32  ;;  %v1768_v32 = vld [vmem:[#allocation7 + $0x304] ss:$8 sps:$4 sm:$0xff]  }
  0xd0   :  { %794 = vmatmul.mubr.bf16.vlgmr.msra.gmra.mrb[0].mxu0 %v111_v35  ;;  %v1766_v35 = vld [vmem:[#allocation7 + $0x300] ss:$8 sps:$4 sm:$0xff]  }
  0xd1   :  { %803 = vmatpush1.bf16.msra.mxu0 %v1718_v37  ;;  %834 = vmatprep.mubr.bf16.mxu0 %v114_v38  ;;  %v1961_v37 = vmov 0   ;;  %v108_v38 = vld [vmem:[#allocation4 + $0x30] sm:$0xff] }
  0xd2   :  { %804 = vmatprep.subr.bf16.mxu0 %v1723_v39  ;;  %v115_v39 = vpack.c.bf16 %v108_v38, %v108_v38 }
  0xd5   :  { %805 = vmatpush1.bf16.msra.mxu0 %v1721_v41  ;;  %v2146_v41 = vld [vmem:[#allocation9 + $0xe4] ss:$8 sps:$4 sm:$0xff]  }
  0xd6   :  { %806 = vmatprep.subr.bf16.mxu0 %v1726_v42  ;;  %v2148_v42 = vld [vmem:[#allocation9 + $0xe0] ss:$8 sps:$4 sm:$0xff]   ;;  %1120 = vmatprep.subr.bf16.mxu1 %v2146_v41 }
  0xd7   :  { %1121 = vmatpush1.bf16.msra.mxu1 %v2148_v42 }
  0xd9   :  { %807 = vmatpush1.bf16.msra.mxu0 %v1724_v43  ;;  %v2152_v43 = vld [vmem:[#allocation9 + $0xf4] ss:$8 sps:$4 sm:$0xff]  }
  0xda   :  { %808 = vmatprep.subr.bf16.mxu0 %v1729_v44  ;;  %v2154_v44 = vld [vmem:[#allocation9 + $0xf0] ss:$8 sps:$4 sm:$0xff]   ;;  %1122 = vmatprep.subr.bf16.mxu1 %v2152_v43 }
  0xdb   :  { %1123 = vmatpush1.bf16.msra.mxu1 %v2154_v44 }
  0xdc   :  { %1137 = vmatprep.subr.bf16.mxu1 %v2062_v47 }
  0xdd   :  { %809 = vmatpush1.bf16.msra.mxu0 %v1727_v45  ;;  %v216_v45 = vlaneseq }
  0xde   :  { %810 = vmatprep.subr.bf16.mxu0 %v1732_v46 }
  0xdf   :  { %v217_v46 = vshrl.u32 %v216_v45, 7 }
  0xe1   :  { %811 = vmatpush1.bf16.msra.mxu0 %v1730_v50  ;;  %v218_v50 = vsub.s32 0, %v217_v46 }
  0xe2   :  { %812 = vmatprep.subr.bf16.mxu0 %v1735_v51  ;;  %v214_v51 = vld [vmem:[%s2262_s3] sm:$0x3] }
  0xe5   :  { %813 = vmatpush1.bf16.msra.mxu0 %v1733_v54  ;;  %v222_v54 = vsub.s32 1, %v217_v46 }
  0xe6   :  { %814 = vmatprep.subr.bf16.mxu0 %v1738_v55  ;;  %v219_v55 = vrot.slane %v214_v51, %v218_v50 }
  0xe9   :  { %815 = vmatpush1.bf16.msra.mxu0 %v1736_v57  ;;  %v223_v57 = vrot.slane %v214_v51, %v222_v54  ;;  %v1558_v51 = vld [vmem:[%s99_s23] ss:$0 sm:$0xff] }
  0xea   :  { %816 = vmatprep.subr.bf16.mxu0 %v1741_v59 }
  0xed   :  { %817 = vmatpush1.bf16.msra.mxu0 %v1739_v61 }
  0xee   :  { %818 = vmatprep.subr.bf16.mxu0 %v1744_v63 }
  0xf1   :  { %819 = vmatpush1.bf16.msra.mxu0 %v1742_v2 }
  0xf2   :  { %820 = vmatprep.subr.bf16.mxu0 %v1747_v3 }
  0xf5   :  { %821 = vmatpush1.bf16.msra.mxu0 %v1745_v6 }
  0xf6   :  { %822 = vmatprep.subr.bf16.mxu0 %v1750_v7 }
  0xf9   :  { %823 = vmatpush1.bf16.msra.mxu0 %v1748_v10 }
  0xfa   :  { %824 = vmatprep.subr.bf16.mxu0 %v1753_v11 }
  0xfd   :  { %825 = vmatpush1.bf16.msra.mxu0 %v1751_v14 }
  0xfe   :  { %826 = vmatprep.subr.bf16.mxu0 %v1756_v15  ;;  %v918_v15 = vld [vmem:[%s2264_s5] sm:$0x3] }
 0x101   :  { %827 = vmatpush1.bf16.msra.mxu0 %v1754_v18  ;;  %v2197_v18 = vrot.slane %v918_v15, %v218_v50 }
 0x102   :  { %828 = vmatprep.subr.bf16.mxu0 %v1759_v19  ;;  %v2199_v19 = vrot.slane %v918_v15, %v222_v54 }
 0x105   :  { %829 = vmatpush1.bf16.msra.mxu0 %v1757_v22 }
 0x106   :  { %830 = vmatprep.subr.bf16.mxu0 %v1762_v23 }
 0x109   :  { %831 = vmatpush1.bf16.msra.mxu0 %v1760_v26 }
 0x10a   :  { %832 = vmatprep.subr.bf16.mxu0 %v1765_v27 }
 0x10d   :  { %833 = vmatpush1.bf16.msra.mxu0 %v1763_v30 }
 0x10e   :  { %843 = vmatprep.subr.bf16.mxu0 %v1768_v32 }
 0x110   :  { %835 = vmatmul.mubr.bf16.vlgmr.msra.gmra.mrb[0].mxu0 %v113_v33 }
 0x111   :  { %844 = vmatpush1.bf16.msra.mxu0 %v1766_v35  ;;  %875 = vmatprep.mubr.bf16.mxu0 %v1961_v37 }
 0x11c   :  { %1525 = vmatmul.mubr.msk.bf16.vlgmr.msra.gmra.mrb[0].mxu0 %vm716_vm0, %v115_v39 }
 0x1ef   :  { %v877_v59 = vpop.f32.mrb[0].mxu0 }
 0x1f0   :  { %v1598_v61 = vadd.f32 %v877_v59, %v219_v55  ;;  %v879_v63 = vpop.f32.mrb[1].mxu0 }
 0x1f1   :  { %v1599_v2 = vadd.f32 %v879_v63, %v223_v57  ;;  %v881_v3 = vpop.f32.mrb[2].mxu0 }
 0x1f2   :  { %v884_v6 = vmax.f32 %v1598_v61, 0.0  ;;  %v882_v7 = vpop.f32.mrb[3].mxu0 }
 0x1f3   :  { %v885_v10 = vmax.f32 %v1599_v2, 0.0 }
 0x1f4   :  { %v930_v14 = vpack.c.bf16 %v884_v6, %v884_v6 }
 0x1f5   :  { %v931_v11 = vpack.c.bf16 %v885_v10, %v885_v10 }
 0x1f7   :  { %1124 = vmatprep.mubr.bf16.mxu1 %v931_v11 }
 0x1f8   :  { %1125 = vmatmul.mubr.bf16.vlgmr.msra.gmra.mrb[0].mxu1 %v930_v14 }
 0x1f9   :  { %1138 = vmatpush1.bf16.msra.mxu1 %v2064_v48 }
 0x1fa   :  { %1139 = vmatprep.subr.bf16.mxu1 %v2066_v49 }
 0x1fd   :  { %1140 = vmatpush1.bf16.msra.mxu1 %v2070_v52 }
 0x1fe   :  { %1141 = vmatprep.subr.bf16.mxu1 %v2073_v53 }
 0x201   :  { %1142 = vmatpush1.bf16.msra.mxu1 %v2076_v56 }
 0x202   :  { %1143 = vmatprep.subr.bf16.mxu1 %v2079_v58 }
 0x205   :  { %1144 = vmatpush1.bf16.msra.mxu1 %v2081_v60 }
 0x206   :  { %1145 = vmatprep.subr.bf16.mxu1 %v2084_v62 }
 0x209   :  { %1146 = vmatpush1.bf16.msra.mxu1 %v2087_v0 }
 0x20a   :  { %1147 = vmatprep.subr.bf16.mxu1 %v2089_v1 }
 0x20d   :  { %1148 = vmatpush1.bf16.msra.mxu1 %v2093_v4 }
 0x20e   :  { %1149 = vmatprep.subr.bf16.mxu1 %v2095_v5 }
 0x211   :  { %1150 = vmatpush1.bf16.msra.mxu1 %v2100_v8 }
 0x212   :  { %1151 = vmatprep.subr.bf16.mxu1 %v2103_v9 }
 0x215   :  { %1152 = vmatpush1.bf16.msra.mxu1 %v2106_v12 }
 0x216   :  { %1153 = vmatprep.subr.bf16.mxu1 %v2109_v13 }
 0x219   :  { %1154 = vmatpush1.bf16.msra.mxu1 %v2112_v16 }
 0x21a   :  { %1155 = vmatprep.subr.bf16.mxu1 %v2115_v17 }
 0x21d   :  { %1156 = vmatpush1.bf16.msra.mxu1 %v2118_v20 }
 0x21e   :  { %1157 = vmatprep.subr.bf16.mxu1 %v2121_v21 }
 0x221   :  { %1158 = vmatpush1.bf16.msra.mxu1 %v2124_v24 }
 0x222   :  { %1159 = vmatprep.subr.bf16.mxu1 %v2127_v25 }
 0x225   :  { %1160 = vmatpush1.bf16.msra.mxu1 %v2130_v28 }
 0x226   :  { %1161 = vmatprep.subr.bf16.mxu1 %v2133_v29 }
 0x229   :  { %1162 = vmatpush1.bf16.msra.mxu1 %v2136_v34 }
 0x22a   :  { %1163 = vmatprep.subr.bf16.mxu1 %v2139_v36 }
 0x22d   :  { %1164 = vmatpush1.bf16.msra.mxu1 %v2142_v40 }
 0x22e   :  { %1165 = vmatprep.subr.bf16.mxu1 %v2146_v41 }
 0x231   :  { %1166 = vmatpush1.bf16.msra.mxu1 %v2148_v42 }
 0x232   :  { %1167 = vmatprep.subr.bf16.mxu1 %v2152_v43 }
 0x235   :  { %1168 = vmatpush1.bf16.msra.mxu1 %v2154_v44 }
 0x236   :  { %1182 = vmatprep.subr.bf16.mxu1 %v2062_v47 }
 0x2cb   :  { %v1126_v22 = vpop.f32.mrb[0].mxu1 }
 0x2cc   :  { %v1127_v23 = vadd.f32 %v1126_v22, %v2197_v18  ;;  %v1128_v26 = vpop.f32.mrb[1].mxu1 }
 0x2cd   :  { %v1129_v27 = vadd.f32 %v1128_v26, %v2199_v19  ;;  %v1130_v30 = vpop.f32.mrb[2].mxu1 }
 0x2ce   :  { %v1133_v31 = vmax.f32 %v1127_v23, 0.0  ;;  %v1131_v32 = vpop.f32.mrb[3].mxu1 }
 0x2cf   :  { %v1134_v33 = vmax.f32 %v1129_v27, 0.0 }
 0x2d0   :  { %v1135_v47 = vpack.c.bf16 %v1133_v31, %v1133_v31 }
 0x2d1   :  { %v1136_v35 = vpack.c.bf16 %v1134_v33, %v1134_v33 }
 0x2d3   :  { %1169 = vmatprep.mubr.bf16.mxu1 %v1136_v35 }
 0x2d4   :  { %1170 = vmatmul.mubr.bf16.vlgmr.msra.gmra.mrb[4].mxu1 %v1135_v47 }
 0x2d5   :  { %1183 = vmatpush1.bf16.msra.mxu1 %v2064_v48  ;;  %v1817_v48 = vld [vmem:[#allocation10 + $0x40] sm:$0xff]  }
 0x2d6   :  { %1184 = vmatprep.subr.bf16.mxu1 %v2066_v49 }
 0x2d9   :  { %1185 = vmatpush1.bf16.msra.mxu1 %v2070_v52 }
 0x2da   :  { %1186 = vmatprep.subr.bf16.mxu1 %v2073_v53 }
 0x2dd   :  { %1187 = vmatpush1.bf16.msra.mxu1 %v2076_v56 }
 0x2de   :  { %1188 = vmatprep.subr.bf16.mxu1 %v2079_v58 }
 0x2e1   :  { %1189 = vmatpush1.bf16.msra.mxu1 %v2081_v60 }
 0x2e2   :  { %1190 = vmatprep.subr.bf16.mxu1 %v2084_v62 }
 0x2e5   :  { %1191 = vmatpush1.bf16.msra.mxu1 %v2087_v0 }
 0x2e6   :  { %1192 = vmatprep.subr.bf16.mxu1 %v2089_v1 }
 0x2e9   :  { %1193 = vmatpush1.bf16.msra.mxu1 %v2093_v4  ;;  %v1818_v4 = vld [vmem:[#allocation10] sm:$0xff]  }
 0x2ea   :  { %1194 = vmatprep.subr.bf16.mxu1 %v2095_v5 }
 0x2ed   :  { %1195 = vmatpush1.bf16.msra.mxu1 %v2100_v8  ;;  %v1819_v8 = vld [vmem:[#allocation10 + $0x48] sm:$0xff]  }
 0x2ee   :  { %1196 = vmatprep.subr.bf16.mxu1 %v2103_v9  ;;  %v1820_v9 = vld [vmem:[#allocation10 + $0x8] sm:$0xff]  }
 0x2f1   :  { %1197 = vmatpush1.bf16.msra.mxu1 %v2106_v12  ;;  %v1821_v12 = vld [vmem:[#allocation10 + $0x50] sm:$0xff]  }
 0x2f2   :  { %1198 = vmatprep.subr.bf16.mxu1 %v2109_v13  ;;  %v1822_v13 = vld [vmem:[#allocation10 + $0x10] sm:$0xff]  }
 0x2f5   :  { %1199 = vmatpush1.bf16.msra.mxu1 %v2112_v16  ;;  %v1823_v16 = vld [vmem:[#allocation10 + $0x58] sm:$0xff]  }
 0x2f6   :  { %1200 = vmatprep.subr.bf16.mxu1 %v2115_v17  ;;  %v1824_v17 = vld [vmem:[#allocation10 + $0x18] sm:$0xff]  }
 0x2f9   :  { %1201 = vmatpush1.bf16.msra.mxu1 %v2118_v20  ;;  %v1825_v20 = vld [vmem:[#allocation10 + $0x60] sm:$0xff]  }
 0x2fa   :  { %1202 = vmatprep.subr.bf16.mxu1 %v2121_v21  ;;  %v1826_v21 = vld [vmem:[#allocation10 + $0x20] sm:$0xff]  }
 0x2fd   :  { %1203 = vmatpush1.bf16.msra.mxu1 %v2124_v24  ;;  %v1827_v24 = vld [vmem:[#allocation10 + $0x68] sm:$0xff]  }
 0x2fe   :  { %1204 = vmatprep.subr.bf16.mxu1 %v2127_v25  ;;  %v1828_v25 = vld [vmem:[#allocation10 + $0x28] sm:$0xff]  }
 0x301   :  { %1205 = vmatpush1.bf16.msra.mxu1 %v2130_v28  ;;  %v1829_v28 = vld [vmem:[#allocation10 + $0x70] sm:$0xff]  }
 0x302   :  { %1206 = vmatprep.subr.bf16.mxu1 %v2133_v29  ;;  %v1830_v29 = vld [vmem:[#allocation10 + $0x30] sm:$0xff]  }
 0x305   :  { %1207 = vmatpush1.bf16.msra.mxu1 %v2136_v34  ;;  %v1831_v34 = vld [vmem:[#allocation10 + $0x78] sm:$0xff]  }
 0x306   :  { %1208 = vmatprep.subr.bf16.mxu1 %v2139_v36  ;;  %v1832_v36 = vld [vmem:[#allocation10 + $0x38] sm:$0xff]  }
 0x309   :  { %1209 = vmatpush1.bf16.msra.mxu1 %v2142_v40 }
 0x30a   :  { %1210 = vmatprep.subr.bf16.mxu1 %v2146_v41 }
 0x30d   :  { %1211 = vmatpush1.bf16.msra.mxu1 %v2148_v42 }
 0x30e   :  { %1212 = vmatprep.subr.bf16.mxu1 %v2152_v43 }
 0x311   :  { %1213 = vmatpush1.bf16.msra.mxu1 %v2154_v44 }
 0x312   :  { %1576 = vmatprep.subr.bf16.mxu1 %v1817_v48 }
 0x3a7   :  { %v1171_v49 = vpop.f32.mrb[4].mxu1 }
 0x3a8   :  { %v1172_v52 = vadd.f32 %v1171_v49, %v2197_v18  ;;  %v1173_v53 = vpop.f32.mrb[5].mxu1 }
 0x3a9   :  { %v1174_v56 = vadd.f32 %v1173_v53, %v2199_v19  ;;  %v1175_v58 = vpop.f32.mrb[6].mxu1 }
 0x3aa   :  { %v1178_v60 = vmax.f32 %v1172_v52, 0.0  ;;  %v1176_v62 = vpop.f32.mrb[7].mxu1 }
 0x3ab   :  { %v1179_v0 = vmax.f32 %v1174_v56, 0.0 }
 0x3ac   :  { %v1180_v5 = vpack.c.bf16 %v1178_v60, %v1178_v60 }
 0x3ad   :  { %v1181_v1 = vpack.c.bf16 %v1179_v0, %v1179_v0 }
 0x3af   :  { %1214 = vmatprep.mubr.bf16.mxu1 %v1181_v1 }
 0x3b0   :  { %1215 = vmatmul.mubr.bf16.vlgmr.msra.gmra.mrb[8].mxu1 %v1180_v5 }
 0x3b1   :  { %1577 = vmatpush3.bf16.msra.mxu1 %v1818_v4 }
 0x3b2   :  { %1578 = vmatprep.subr.bf16.mxu1 %v1819_v8 }
 0x3b5   :  { %1579 = vmatpush3.bf16.msra.mxu1 %v1820_v9 }
 0x3b6   :  { %1580 = vmatprep.subr.bf16.mxu1 %v1821_v12 }
 0x3b9   :  { %1581 = vmatpush3.bf16.msra.mxu1 %v1822_v13 }
 0x3ba   :  { %1582 = vmatprep.subr.bf16.mxu1 %v1823_v16 }
 0x3bd   :  { %1583 = vmatpush3.bf16.msra.mxu1 %v1824_v17 }
 0x3be   :  { %1584 = vmatprep.subr.bf16.mxu1 %v1825_v20 }
 0x3c1   :  { %1585 = vmatpush3.bf16.msra.mxu1 %v1826_v21 }
 0x3c2   :  { %1586 = vmatprep.subr.bf16.mxu1 %v1827_v24 }
 0x3c5   :  { %1587 = vmatpush3.bf16.msra.mxu1 %v1828_v25 }
 0x3c6   :  { %1588 = vmatprep.subr.bf16.mxu1 %v1829_v28 }
 0x3c9   :  { %1589 = vmatpush3.bf16.msra.mxu1 %v1830_v29 }
 0x3ca   :  { %1590 = vmatprep.subr.bf16.mxu1 %v1831_v34 }
 0x3cd   :  { %1591 = vmatpush3.bf16.msra.mxu1 %v1832_v36 }
 0x483   :  { %v1216_v40 = vpop.f32.mrb[8].mxu1 }
 0x484   :  { %v1217_v37 = vadd.f32 %v1216_v40, %v2197_v18  ;;  %v1218_v38 = vpop.f32.mrb[9].mxu1 }
 0x485   :  { %v1219_v39 = vadd.f32 %v1218_v38, %v2199_v19  ;;  %v1220_v41 = vpop.f32.mrb[10].mxu1 }
 0x486   :  { %v1223_v42 = vmax.f32 %v1217_v37, 0.0  ;;  %v1221_v43 = vpop.f32.mrb[11].mxu1 }
 0x487   :  { %v1224_v44 = vmax.f32 %v1219_v39, 0.0 }
 0x488   :  { %v1225_v46 = vpack.c.bf16 %v1223_v42, %v1223_v42 }
 0x489   :  { %v1226_v45 = vpack.c.bf16 %v1224_v44, %v1224_v44 }
 0x48b   :  { %1394 = vmatprep.mubr.bf16.mxu1 %v1226_v45 }
 0x48c   :  { %1395 = vmatmul.mubr.bf16.vlgmr.msra.gmra.mrb[12].mxu1 %v1225_v46 }
 0x55f   :  { %v1592_v50 = vpop.f32.mrb[12].mxu1 }
 0x560   :  { %v1593_v54 = vpop.f32.mrb[13].mxu1 }
 0x561   :  { %v1594_v55 = vadd.f32 %v1593_v54, %v1592_v50  ;;  %v1595_v57 = vpop.f32.mrb[14].mxu1 }
 0x562   :  { %v1596_v59 = vpop.f32.mrb[15].mxu1 }
 0x563   :  { %v1397_v61 = vadd.f32 %v1594_v55, %v1558_v51 }
 0x565   :  { %1402 = vst [vmem:[#allocation12] sm:$0xff] %v1397_v61 }
 0x566   :  { %1934 = shalt.err (!%p1931_p13)
}
 0x567   :  { %s1935_s7 = scalar_lea.hbm %s2267_s8, 128 }
 0x568   :  { %p1936_p0 = scmp.ne.s32.totalorder %s2267_s8, %s1935_s7  ;;  %p1939_p1 = scmp.lt.u32.totalorder %s1935_s7, %s2267_s8 }
 0x56a   :  { %p1941_p2 = pnand %p1939_p1, %p1936_p0 }
 0x56c   :  { %1944 = shalt.err (!%p1941_p2)
}
 0x56d   :  { %1412 = dma.vmem_to_hbm [thread:$0]  %s1410_s20, 128, %s2267_s8, [#allocation6]  }
 0x56e   :  { %1951 = dma.done.wait [#allocation6], 128  }
 0x56f   :  { %1952 = vsyncadd [#allocation6], 4294967168 }
 0x570   :  { %1416 = vsyncpa [#allocation5], 1 }
 0x571   :  { %1417 = vsyncpa [#allocation8], 1 }
 0x572   :  { %1418 = vsyncpa [#allocation11], 1 }
 0x573   :  { %1419 = vsyncpa [#allocation6], 1 }

</bundles_post_ra>
